<compile_context>
chip_gen: v5e
topology: v5e:2x2
jax: 0.10.0
libtpu: 0.0.40
codegen_flags: <defaults>
</compile_context>

<pallas_src>
import jax
import jax.numpy as jnp
from jax.experimental import pallas as pl
from jax.experimental.pallas import tpu as pltpu

WORLD_SIZE = 4


def _reduce_scatter_kernel(x_ref, o_ref):
    # x_ref: (W, tile_n, tile_d) -- all W rank-local slabs for this tile.
    # o_ref: (tile_n, tile_d)    -- the reduced slab.
    # Load per-rank slices inside the (statically unrolled) loop: only one
    # input slab + the f32 accumulator are live at a time.
    acc = x_ref[0]
    if acc.dtype != jnp.float32:
        acc = acc.astype(jnp.float32)
    for w in range(1, x_ref.shape[0]):       # W is small (4): static unroll
        xw = x_ref[w]
        if xw.dtype != jnp.float32:
            xw = xw.astype(jnp.float32)
        acc = acc + xw
    o_ref[...] = acc.astype(o_ref.dtype)


def _round_up(x, m):
    return ((x + m - 1) // m) * m


def _vmem_budget_bytes():
    """Generation-aware per-tile VMEM budget (double-buffered in+out), leaving
    headroom for Mosaic internal scratch."""
    try:
        vmem = pltpu.get_tpu_info().vmem_capacity_bytes
    except Exception:
        vmem = None
    if vmem is None:
        return 24 * 1024 * 1024                 # conservative (fits every gen)
    if vmem >= 128 * 1024 * 1024:               # v5e / v6e: 128 MiB physical
        return 48 * 1024 * 1024
    if vmem >= 64 * 1024 * 1024:                # v7x: 64 MiB per TensorCore
        return 24 * 1024 * 1024
    return max(8 * 1024 * 1024, vmem // 3)


def _pick_tiles(n, d, w, dtype, budget_bytes):
    """Choose (tile_n, tile_d) for a cdiv grid.

    tile_d: full D when small, else 1024 lanes (multiple of 128 -> unmasked,
            lane-dense full-vreg stores).
    tile_n: target 512 rows under the VMEM budget, capped so the parallel N
            axis has >= 2 (ideally >= 4) grid steps for megacore + pipelining.
    """
    itemsize = jnp.dtype(dtype).itemsize
    sub = 16 if itemsize == 2 else 8            # sublane alignment

    tile_d = d if d <= 1024 else 1024

    # Double-buffered (W, tile_n, tile_d) input + double-buffered output.
    bytes_per_row = (2 * w + 2) * tile_d * itemsize
    max_rows = max(sub, (budget_bytes // bytes_per_row) // sub * sub)
    tile_n = min(512, max_rows)

    # Guarantee multiple grid steps along N when N allows.
    if n >= 4 * sub:
        tile_n = min(tile_n, _round_up(pl.cdiv(n, 4), sub))
    elif n >= 2 * sub:
        tile_n = min(tile_n, _round_up(pl.cdiv(n, 2), sub))

    if n < sub:
        tile_n = n                              # tiny N: full-extent block
    else:
        tile_n = max(sub, min(tile_n, (n // sub) * sub))
    return tile_n, tile_d


def reduce_scatter_sum(x_all, *, tile_n=None, tile_d=None):
    """x_all: (W, N, D) stacked rank-local tensors -> (W, N//W, D) per-rank outputs."""
    W, N, D = x_all.shape
    assert W == WORLD_SIZE, "group is fixed to [0, 1, 2, 3]"
    assert N % W == 0, "scatter dim must be divisible by world size"
    chunk = N // W

    budget = _vmem_budget_bytes()
    auto_tn, auto_td = _pick_tiles(N, D, W, x_all.dtype, budget)
    if tile_n is None:
        tile_n = auto_tn
    if tile_d is None:
        tile_d = auto_td

    itemsize = jnp.dtype(x_all.dtype).itemsize
    # Double-buffered input + output footprint, plus headroom for internal scratch.
    footprint = (2 * W + 2) * tile_n * tile_d * itemsize
    vmem_limit = int(footprint + 8 * 1024 * 1024)

    grid = (pl.cdiv(N, tile_n), pl.cdiv(D, tile_d))

    in_spec = pl.BlockSpec((W, tile_n, tile_d), lambda t, c: (0, t, c))
    out_spec = pl.BlockSpec((tile_n, tile_d), lambda t, c: (t, c))

    out_flat = pl.pallas_call(
        _reduce_scatter_kernel,
        out_shape=jax.ShapeDtypeStruct((N, D), x_all.dtype),
        grid_spec=pltpu.PrefetchScalarGridSpec(
            num_scalar_prefetch=0,
            grid=grid,
            in_specs=[in_spec],
            out_specs=out_spec,
        ),
        compiler_params=pltpu.CompilerParams(
            # Both axes are independent (no cross-step accumulation); shards
            # tiles across the two TensorCores on v7x, harmless on v5e/v6e.
            dimension_semantics=("parallel", "parallel"),
            vmem_limit_bytes=vmem_limit,
        ),
    )(x_all)

    # Scatter along dim 0: rank r receives rows [r*chunk, (r+1)*chunk).
    return out_flat.reshape(W, chunk, D)


if __name__ == "__main__":
    # Deterministic rank-local inputs: 4 ranks, each x_r of shape [32, 128].
    key = jax.random.PRNGKey(0)
    W, N, D = WORLD_SIZE, 32, 128
    x_all = jax.random.normal(key, (W, N, D), dtype=jnp.float32)

    out = reduce_scatter_sum(x_all)
    out = jax.block_until_ready(out)

    # Reference: element-wise sum over ranks, scattered along dim 0.
    ref = jnp.sum(x_all, axis=0).reshape(W, N // W, D)
    assert out.shape == (W, N // W, D)
    assert jnp.allclose(out, ref, atol=1e-5, rtol=1e-5)

    print("KERNEL_OK")
</pallas_src>

<mosaic_0001>
module attributes {stable_mosaic.version = 11 : i64} {
  func.func @_reduce_scatter_kernel(%arg0: i32, %arg1: i32, %arg2: memref<4x8x128xf32, #tpu.memory_space<vmem>>, %arg3: memref<8x128xf32, #tpu.memory_space<vmem>>) attributes {dimension_semantics = [#tpu.dimension_semantics<parallel>, #tpu.dimension_semantics<parallel>], iteration_bounds = array<i64: 4, 1>, scalar_prefetch = 0 : i64, scratch_operands = 0 : i64, tpu.core_type = #tpu.core_type<tc>, window_params = [{transform_indices = @transform_0, window_bounds = array<i64: 4, 8, 128>}, {transform_indices = @transform_1, window_bounds = array<i64: 8, 128>}]} {
    %c0 = arith.constant 0 : index
    %c0_0 = arith.constant 0 : index
    %c0_1 = arith.constant 0 : index
    %0 = vector.load %arg2[%c0, %c0_0, %c0_1] : memref<4x8x128xf32, #tpu.memory_space<vmem>>, vector<1x8x128xf32>
    %1 = vector.shape_cast %0 : vector<1x8x128xf32> to vector<8x128xf32>
    %c1 = arith.constant 1 : index
    %c0_2 = arith.constant 0 : index
    %c0_3 = arith.constant 0 : index
    %2 = vector.load %arg2[%c1, %c0_2, %c0_3] : memref<4x8x128xf32, #tpu.memory_space<vmem>>, vector<1x8x128xf32>
    %3 = vector.shape_cast %2 : vector<1x8x128xf32> to vector<8x128xf32>
    %4 = arith.addf %1, %3 : vector<8x128xf32>
    %c2 = arith.constant 2 : index
    %c0_4 = arith.constant 0 : index
    %c0_5 = arith.constant 0 : index
    %5 = vector.load %arg2[%c2, %c0_4, %c0_5] : memref<4x8x128xf32, #tpu.memory_space<vmem>>, vector<1x8x128xf32>
    %6 = vector.shape_cast %5 : vector<1x8x128xf32> to vector<8x128xf32>
    %7 = arith.addf %4, %6 : vector<8x128xf32>
    %c3 = arith.constant 3 : index
    %c0_6 = arith.constant 0 : index
    %c0_7 = arith.constant 0 : index
    %8 = vector.load %arg2[%c3, %c0_6, %c0_7] : memref<4x8x128xf32, #tpu.memory_space<vmem>>, vector<1x8x128xf32>
    %9 = vector.shape_cast %8 : vector<1x8x128xf32> to vector<8x128xf32>
    %10 = arith.addf %7, %9 : vector<8x128xf32>
    %c0_8 = arith.constant 0 : index
    %c0_9 = arith.constant 0 : index
    %11 = vector.load %arg3[%c0_8, %c0_9] : memref<8x128xf32, #tpu.memory_space<vmem>>, vector<8x128xf32>
    tpu.vector_store %arg3[%c0_8, %c0_9], %10 {strides = array<i32>} : memref<8x128xf32, #tpu.memory_space<vmem>>, vector<8x128xf32>,
    return
  }
  func.func @transform_0(%arg0: i32, %arg1: i32) -> (i32, i32, i32) {
    %c0_i32 = arith.constant 0 : i32
    %c0_i32_0 = arith.constant 0 : i32
    return %c0_i32, %arg0, %arg1 : i32, i32, i32
  }
  func.func @transform_1(%arg0: i32, %arg1: i32) -> (i32, i32) {
    %c0_i32 = arith.constant 0 : i32
    return %arg0, %arg1 : i32, i32
  }
}

</mosaic_0001>

<bundles_post_ra>
// kernel: tpu_custom_call.1
= control target key start
LH: loop header
LB: loop body
LE: loop exit
PB: predicated region body
PF: predicated region fallthrough
CT: control target
= control target key end

     0   :  { %6 = vsyncpa [#allocation3], 0  ;;  %s588_s0 = inlined_call_operand.hbm [shape: f32[4,32,128], index: 0, kind: input, shape index: {}]   ;;  %s589_s1 = inlined_call_operand.hbm [shape: f32[32,128], index: 1, kind: output, shape index: {}]  }
   0x1   :  { %8 = vsyncpa [#allocation3 + $0x1], 0 }
   0x2   :  { %9 = vsyncpa [#allocation4], 0 }
   0x3   :  { %11 = vsyncpa [#allocation4 + $0x1], 0  ;;  %s469_s6 = smov 0   ;;  %s471_s7 = smov 0  }
   0x4   :  { %s473_s8 = smov 0   ;;  %s475_s9 = smov 0  }
   0x5   :  { %s477_s10 = smov 0   ;;  %s479_s11 = smov 0  }
   0x6 LB: > { %s261_s12 = sadd.s32 4294967295, %s454_s11   ;;  %s262_s13 = sadd.s32 4294967294, %s454_s11   ;;  %s454_s11 = sphi %s479_s11, %s17_s11   ;;  %s450_s10 = sphi %s477_s10, %s598_s10   ;;  %s446_s9 = sphi %s475_s9, %s597_s9   ;;  %s442_s8 = sphi %s473_s8, %s596_s8   ;;  %s438_s7 = sphi %s471_s7, %s595_s7   ;;  %s434_s6 = sphi %s469_s6, %s594_s6  }
   0x7   : > { %s29_s14 = sadd.s32 1, %s450_s10  ;;  %s38_s15 = sadd.s32 1, %s442_s8 }
   0x8   : > { %p31_p0 = scmp.ge.s32.totalorder %s29_s14, 4  ;;  %p45_p1 = scmp.ne.s32.totalorder %s442_s8, %s438_s7 }
   0x9   : > { %p46_p2 = scmp.eq.s32.totalorder %s454_s11, 0  ;;  %p51_p3 = scmp.ne.s32.totalorder %s438_s7, %s434_s6 }
   0xa   : > { %s600_s14 = smov (%p31_p0, %s29_s14), 0  ;;  %p52_p5 = scmp.eq.s32.totalorder %s261_s12, 0 }
   0xb   : > { %p510_p4 = por %p46_p2, %p45_p1  ;;  %s33_s17 = ssub.s32 %s450_s10, %s600_s14 }
   0xc   : > { %p77_p6 = scmp.eq.s32.totalorder %s261_s12, 3  ;;  %p36_p7 = scmp.eq.s32.totalorder %s33_s17, 0 }
   0xd   : > { %p516_p8 = por %p52_p5, %p51_p3  ;;  %p83_p10 = scmp.eq.s32.totalorder %s262_s13, 3 }
   0xe   : > { %p520_p9 = por %p77_p6, %p45_p1  ;;  %p289_p12 = scmp.lt.s32.totalorder %s454_s11, 4 }
   0xf   : > { %s525_s20 = scalar_select %p36_p7, %s442_s8, %s38_s15  }
  0x10   : > { %p527_p11 = por %p83_p10, %p51_p3  ;;  %s103_s22 = sand.u32 1, %s442_s8  }
  0x11   : > { %s265_s23 = sshll.u32 %s103_s22, 5  ;;  %s266_s24 = sshll.u32 %s450_s10, 3 }
  0x12   : > { %s112_s27 = scalar_lea.hbm %s588_s0, %s266_s24  ;;  %s107_s28 = scalar_lea.vmem [#allocation2], %s265_s23 }
  0x13   : > { %s115_s29 = sshll.u32 %s107_s28, 4  ;;  %s113_s30 = sshll.u32 %s112_s27, 4  ;;  %s116_s29 = int_to_ptr.vmem [resolvable:$true] %s115_s29  ;;  %s114_s30 = int_to_ptr.hbm [resolvable:$true] %s113_s30 }
  0x14   : > { %p282_p13 = pnand %p289_p12, %p510_p4  ;;  %s104_s2 = scalar_lea.sflag [#allocation3], %s103_s22 }
  0x15   : > { %s456_s3 = smov 512   ;;  %s457_s4 = smov 128  }
  0x16   : > { %s458_s5 = smov 8   ;;  %p267_p0 = scmp.ge.s32.totalorder %s454_s11, 1 }
  0x17   : > { %284 = dma.hbm_to_vmem [thread:$0]  (!%p282_p13), %s114_s30, 512, %s116_s29, %s104_s2, %s456_s3, %s457_s4, %s458_s5  }
  0x18   : > { %p123_p1 = scmp.lt.s32.totalorder %s454_s11, 5 }
  0x1a   : > { %p124_p2 = pnand %p267_p0, %p123_p1 }
  0x1b   : > { %s542_s12 = sand.u32 (!%p124_p2), 1, %s438_s7  }
  0x1c   : > { %127 = sbr.rel (%p124_p2) target bundleno = 49 (0x31), region = 24  ;;  %s268_s13 = sshll.u32 (!%p124_p2), %s542_s12, 5 }
  0x1d   : > { %s130_s15 = scalar_lea.sflag (!%p124_p2), [#allocation3], %s542_s12  ;;  %s133_s17 = scalar_lea.vmem (!%p124_p2), [#allocation2], %s268_s13 }
  0x21   : > { %425 = dma.done.wait (%p516_p8), %s130_s15, 512  }
  0x22   : > { %427 = vsyncadd (%p516_p8), %s130_s15, 4294966784  ;;  %s269_s16 = sshll.u32 %s542_s12, 3  ;;  %s274_s22 = sshll.u32 %s446_s9, 3  ;;  %v153_v0 = vld [vmem:[%s133_s17] sm:$0xff]  ;;  %v270_v1 = vld [vmem:[%s133_s17 + $0x8] sm:$0xff] }
  0x23   : > { %s176_s25 = scalar_lea.hbm %s589_s1, %s274_s22  ;;  %v271_v2 = vld [vmem:[%s133_s17 + $0x10] sm:$0xff]  ;;  %v156_v3 = vadd.f32 %v270_v1, %v153_v0  ;;  %v272_v4 = vld [vmem:[%s133_s17 + $0x18] sm:$0xff]  ;;  %s152_s26 = scalar_lea.vmem [#allocation5], %s269_s16 }
  0x24   : > { %s178_s27 = sshll.u32 %s152_s26, 4  ;;  %s180_s28 = sshll.u32 %s176_s25, 4  ;;  %s179_s27 = int_to_ptr.vmem [resolvable:$true] %s178_s27  ;;  %s181_s28 = int_to_ptr.hbm [resolvable:$true] %s180_s28 }
  0x25   : > { %v159_v5 = vadd.f32 %v271_v2, %v156_v3  ;;  %s165_s18 = scalar_lea.sflag [#allocation4], %s542_s12  ;;  %s386_s9 = sshra.s32 %s181_s28, 4  ;;  %s387_s9 = int_to_ptr.hbm [resolvable:$true] %s386_s9 }
  0x26   : > { %s388_s29 = scalar_lea.hbm %s387_s9, 8  ;;  %s392_s3 = scalar_lea.hbm %s589_s1, 32 }
  0x27   : > { %v162_v6 = vadd.f32 %v272_v4, %v159_v5  ;;  %p389_p3 = scmp.ne.s32.totalorder %s387_s9, %s388_s29  ;;  %p393_p6 = scmp.lt.s32.totalorder %s387_s9, %s589_s1 }
  0x28   : > { %p394_p7 = scmp.lt.s32.totalorder %s392_s3, %s388_s29 }
  0x29   : > { %163 = vst [vmem:[%s152_s26] sm:$0xff] %v162_v6  ;;  %p390_p4 = pnand %p389_p3, %p520_p9 }
  0x2a   : > { %p395_p8 = por %p394_p7, %p393_p6 }
  0x2b   : > { %p391_p5 = pneg %p390_p4 }
  0x2d   : > { %p396_p10 = pnand %p395_p8, %p391_p5 }
  0x2f   : > { %399 = shalt.err (!%p396_p10)
}
  0x30   : > { %279 = dma.vmem_to_hbm [thread:$0]  (%p520_p9), %s179_s27, 128, %s181_s28, %s165_s18  }
  0x31 PF: > { %p290_p12 = scmp.ge.s32.totalorder %s454_s11, 2  ;;  %s192_s12 = sand.u32 1, %s434_s6  }
  0x32   : > { %s193_s13 = scalar_lea.sflag [#allocation4], %s192_s12 }
  0x33   : > { %p286_p13 = pnand %p290_p12, %p527_p11 }
  0x35   : > { %p287_p0 = pneg %p286_p13 }
  0x37   : > { %429 = dma.done.wait (%p287_p0), %s193_s13, 128  }
  0x38   : > { %431 = vsyncadd (%p287_p0), %s193_s13, 4294967168  ;;  %s17_s11 = sadd.s32 1, %s454_s11   ;;  %s594_s6 = smov %s438_s7 }
  0x39   : > { %p14_p1 = scmp.ge.s32.totalorder %s17_s11, 6   ;;  %s595_s7 = smov %s442_s8 }
  0x3a   : > { %s596_s8 = smov %s525_s20  ;;  %s597_s9 = smov %s450_s10 }
  0x3b   : > { %s598_s10 = smov %s600_s14  ;;  %16 = sbr.rel (!%p14_p1) target bundleno = 6 (0x6), region = 72 }
  0x40   :  { %199 = vsyncpa [#allocation3], 1 }
  0x41   :  { %201 = vsyncpa [#allocation3 + $0x1], 1 }
  0x42   :  { %202 = vsyncpa [#allocation4], 1 }
  0x43   :  { %204 = vsyncpa [#allocation4 + $0x1], 1 }

</bundles_post_ra>
